<compile_context>
chip_gen: v5e
topology: v5e:2x2
jax: 0.10.0
libtpu: 0.0.40
codegen_flags: <defaults>
</compile_context>

<pallas_src>
import jax
import jax.numpy as jnp
from jax.experimental import pallas as pl
from jax.experimental.pallas import tpu as pltpu

LANE = 128
TILE_R_MAX = 2048   # rows per block: multiple of 32 (full int8 vregs), 1 MiB f32/block

# qint8 range (matches torch.qint8)
QMIN = -128.0
QMAX = 127.0


def _quantize_kernel(inv_scale_ref, zp_ref, x_ref, o_ref):
    """Elementwise per-tensor affine quantization on one VMEM tile.

    inv_scale_ref, zp_ref : SMEM scalars (shape (1,), float32)
    x_ref                 : VMEM float32 tile (tile_r, 128)
    o_ref                 : VMEM int8 tile  (tile_r, 128)
    """
    inv_scale = inv_scale_ref[0]
    zp = zp_ref[0]
    x = x_ref[...]
    # torch uses std::nearbyint -> round-half-to-even, same as jnp.round.
    # zp is an integer, so adding it after the round is exact.
    q = jnp.round(x * inv_scale) + zp
    q = jnp.clip(q, QMIN, QMAX)
    o_ref[...] = q.astype(jnp.int8)
    # TODO(synk): torch saturating-casts NaN/Inf; here NaN behavior after clip+cast is unspecified.


def quantize_per_tensor(x, out_scale, out_zero_point):
    """JAX wrapper reproducing Quantize.forward (torch.quantize_linear, qint8).

    Returns the int8 integer representation of the quantized tensor
    (equivalent to torch_quantized_tensor.int_repr()).
    """
    orig_shape = x.shape
    x = x.astype(jnp.float32)
    n = x.size

    # Lane-dense slab. Fast path: pure (free) reshape when n % 128 == 0.
    ragged = (n % LANE) != 0
    xf = x.reshape(-1)
    if ragged:
        xf = jnp.pad(xf, (0, (-n) % LANE))
    rows = xf.size // LANE
    x2 = xf.reshape(rows, LANE)

    # Tile choice: full-array single block for small inputs (always legal),
    # otherwise 2048-row blocks (multiple of 8 for f32 and 32 for int8 vregs)
    # with a partial, masked last block handled by Pallas.
    tile_r = rows if rows <= TILE_R_MAX else TILE_R_MAX
    grid = (pl.cdiv(rows, tile_r),)

    inv_scale = jnp.asarray([1.0 / float(out_scale)], dtype=jnp.float32)
    zp_f = jnp.asarray([float(int(out_zero_point))], dtype=jnp.float32)

    out2 = pl.pallas_call(
        _quantize_kernel,
        out_shape=jax.ShapeDtypeStruct((rows, LANE), jnp.int8),
        grid=grid,
        in_specs=[
            pl.BlockSpec(memory_space=pltpu.SMEM),            # inv_scale
            pl.BlockSpec(memory_space=pltpu.SMEM),            # zero_point (as f32)
            pl.BlockSpec((tile_r, LANE), lambda i: (i, 0)),   # x tile
        ],
        out_specs=pl.BlockSpec((tile_r, LANE), lambda i: (i, 0)),
        compiler_params=pltpu.CompilerParams(
            dimension_semantics=("parallel",),  # shard rows across TCs on v7x
        ),
        cost_estimate=pl.CostEstimate(
            flops=3 * rows * LANE,
            transcendentals=0,
            bytes_accessed=5 * rows * LANE,   # 4B read + 1B write per element
        ),
    )(inv_scale, zp_f, x2)

    if ragged:
        return out2.reshape(-1)[:n].reshape(orig_shape)
    return out2.reshape(orig_shape)


class QuantizeModule:
    """Mirror of the PyTorch Quantize module (qint8 only)."""

    def __init__(self, out_scale, out_zero_point):
        # deterministic "buffers"
        self.out_scale = float(out_scale)
        self.out_zero_point = int(out_zero_point)
        # TODO(synk): only qint8 supported; quint8/qint32 would just change clamp range/out dtype.

    def __call__(self, x):
        return quantize_per_tensor(x, self.out_scale, self.out_zero_point)


if __name__ == "__main__":
    key = jax.random.PRNGKey(0)
    scale, zero_point = 0.05, 2
    qm = QuantizeModule(scale, zero_point)

    # NCHW input, small shape (fast path: numel % 128 == 0)
    x = jax.random.normal(key, (2, 4, 16, 16), dtype=jnp.float32) * 3.0
    q_int = qm(x)
    jax.block_until_ready(q_int)

    ref = jnp.clip(jnp.round(x / scale) + zero_point, -128, 127).astype(jnp.int8)
    assert q_int.shape == x.shape
    assert q_int.dtype == jnp.int8
    assert bool(jnp.all(q_int == ref))

    # Ragged tail path (numel % 128 != 0)
    x2 = jax.random.normal(jax.random.PRNGKey(1), (3, 5, 7), dtype=jnp.float32) * 2.0
    q2 = qm(x2)
    jax.block_until_ready(q2)
    ref2 = jnp.clip(jnp.round(x2 / scale) + zero_point, -128, 127).astype(jnp.int8)
    assert q2.shape == x2.shape
    assert bool(jnp.all(q2 == ref2))

    print("KERNEL_OK")
</pallas_src>

<mosaic_0001>
module attributes {stable_mosaic.version = 11 : i64} {
  func.func @_quantize_kernel(%arg0: i32, %arg1: memref<1xf32, #tpu.memory_space<smem>>, %arg2: memref<1xf32, #tpu.memory_space<smem>>, %arg3: memref<16x128xf32, #tpu.memory_space<vmem>>, %arg4: memref<16x128xi8, #tpu.memory_space<vmem>>) attributes {dimension_semantics = [#tpu.dimension_semantics<parallel>], iteration_bounds = array<i64: 1>, scalar_prefetch = 0 : i64, scratch_operands = 0 : i64, tpu.core_type = #tpu.core_type<tc>, window_params = [{transform_indices = @transform_0, window_bounds = array<i64: 1>}, {transform_indices = @transform_1, window_bounds = array<i64: 1>}, {transform_indices = @transform_2, window_bounds = array<i64: 16, 128>}, {transform_indices = @transform_3, window_bounds = array<i64: 16, 128>}]} {
    %c0 = arith.constant 0 : index
    %0 = memref.load %arg1[%c0] : memref<1xf32, #tpu.memory_space<smem>>
    %c0_0 = arith.constant 0 : index
    %1 = memref.load %arg2[%c0_0] : memref<1xf32, #tpu.memory_space<smem>>
    %c0_1 = arith.constant 0 : index
    %c0_2 = arith.constant 0 : index
    %2 = vector.load %arg3[%c0_1, %c0_2] : memref<16x128xf32, #tpu.memory_space<vmem>>, vector<16x128xf32>
    %3 = vector.broadcast %0 : f32 to vector<16x128xf32>
    %4 = arith.mulf %2, %3 : vector<16x128xf32>
    %5 = math.roundeven %4 : vector<16x128xf32>
    %6 = vector.broadcast %1 : f32 to vector<16x128xf32>
    %7 = arith.addf %5, %6 : vector<16x128xf32>
    %cst = arith.constant -1.280000e+02 : f32
    %cst_3 = arith.constant 1.270000e+02 : f32
    %8 = vector.broadcast %cst : f32 to vector<16x128xf32>
    %9 = arith.maximumf %8, %7 : vector<16x128xf32>
    %10 = vector.broadcast %cst_3 : f32 to vector<16x128xf32>
    %11 = arith.minimumf %10, %9 : vector<16x128xf32>
    %12 = arith.fptosi %11 : vector<16x128xf32> to vector<16x128xi8>
    %c0_4 = arith.constant 0 : index
    %c0_5 = arith.constant 0 : index
    %13 = vector.load %arg4[%c0_4, %c0_5] : memref<16x128xi8, #tpu.memory_space<vmem>>, vector<16x128xi8>
    tpu.vector_store %arg4[%c0_4, %c0_5], %12 {strides = array<i32>} : memref<16x128xi8, #tpu.memory_space<vmem>>, vector<16x128xi8>,
    return
  }
  func.func @transform_0(%arg0: i32) -> i32 {
    %c0_i32 = arith.constant 0 : i32
    %c0_i32_0 = arith.constant 0 : i32
    return %c0_i32 : i32
  }
  func.func @transform_1(%arg0: i32) -> i32 {
    %c0_i32 = arith.constant 0 : i32
    %c0_i32_0 = arith.constant 0 : i32
    return %c0_i32 : i32
  }
  func.func @transform_2(%arg0: i32) -> (i32, i32) {
    %c0_i32 = arith.constant 0 : i32
    %c0_i32_0 = arith.constant 0 : i32
    return %arg0, %c0_i32 : i32, i32
  }
  func.func @transform_3(%arg0: i32) -> (i32, i32) {
    %c0_i32 = arith.constant 0 : i32
    %c0_i32_0 = arith.constant 0 : i32
    return %arg0, %c0_i32 : i32, i32
  }
}

</mosaic_0001>

<bundles_post_ra>
// kernel: tpu_custom_call.1
= control target key start
LH: loop header
LB: loop body
LE: loop exit
PB: predicated region body
PF: predicated region fallthrough
CT: control target
= control target key end

     0   :  { %10 = vsyncpa [#allocation5], 0  ;;  %s206_s0 = inlined_call_operand.<no memory space> [shape: f32[1], index: 0, kind: input, shape index: {}]   ;;  %s207_s1 = inlined_call_operand.<no memory space> [shape: f32[1], index: 1, kind: input, shape index: {}]   ;;  %s208_s2 = inlined_call_operand.hbm [shape: f32[16,128], index: 2, kind: input, shape index: {}]   ;;  %s209_s3 = inlined_call_operand.hbm [shape: s8[16,128], index: 3, kind: output, shape index: {}]  }
   0x1   :  { %11 = vsyncpa [#allocation6], 0  ;;  %s20_s14 = sshll.u32 %s208_s2, 4  ;;  %s168_s15 = smov [#allocation4]   ;;  %s21_s14 = int_to_ptr.hbm [resolvable:$true] %s20_s14 }
   0x2   :  { %s22_s16 = sshll.u32 %s168_s15, 4  ;;  %s169_s17 = smov 128   ;;  %s23_s16 = int_to_ptr.vmem [resolvable:$true] %s22_s16 }
   0x3   :  { %s170_s18 = smov 8  }
   0x4   :  { %28 = dma.hbm_to_vmem [thread:$0]  %s21_s14, 256, %s23_s16, [#allocation5], %s169_s17, %s169_s17, %s170_s18  }
   0x5   :  { %164 = dma.done.wait [#allocation5], 256  }
   0x6   :  { %165 = vsyncadd [#allocation5], 4294967040  ;;  %v37_v0 = vstv %s206_s0  ;;  %v35_v1 = vld [vmem:[#allocation4] sm:$0xff]  ;;  %v36_v2 = vld [vmem:[#allocation4 + $0x8] sm:$0xff]  ;;  %v42_v16 = vstv %s207_s1  ;;  %s171_s0 = smov [#allocation7]   ;;  %s67_s24 = sshll.u32 %s209_s3, 4  ;;  %s68_s24 = int_to_ptr.hbm [resolvable:$true] %s67_s24 }
   0x7   :  { %v38_v3 = vmul.f32 %v37_v0, %v35_v1  ;;  %v39_v4 = vmul.f32 %v37_v0, %v36_v2  ;;  %s65_s1 = sshll.u32 %s171_s0, 4  ;;  %s172_s25 = smov 32   ;;  %s66_s1 = int_to_ptr.vmem [resolvable:$true] %s65_s1 }
   0x8   :  { %s173_s26 = smov 2  }
   0x9   :  { %v86_v5 = vcvt.f32.s32 %v38_v3  ;;  %v84_v6 = vand.u32 2147483647, %v38_v3  ;;  %v94_v7 = vcvt.f32.s32 %v39_v4  ;;  %v89_v9 = vand.u32 2147483648, %v38_v3 }
   0xa   :  { %v92_v10 = vand.u32 2147483647, %v39_v4  ;;  %v97_v12 = vand.u32 2147483648, %v39_v4 }
   0xb   :  { %v87_v8 = vcvt.s32.f32 %v86_v5  ;;  %v95_v11 = vcvt.s32.f32 %v94_v7  ;;  %vm85_vm0 = vcmp.lt.f32.partialorder %v84_v6, 8388608.0 }
   0xc   :  { %vm93_vm1 = vcmp.lt.f32.partialorder %v92_v10, 8388608.0 }
   0xd   :  { %v88_v13 = vand.u32 2147483647, %v87_v8  ;;  %v96_v14 = vand.u32 2147483647, %v95_v11 }
   0xf   :  { %v90_v15 = vor.u32 %v89_v9, %v88_v13  ;;  %v98_v17 = vor.u32 %v97_v12, %v96_v14 }
  0x11   :  { %v91_v18 = vsel %vm85_vm0, %v90_v15, %v38_v3  ;;  %v99_v20 = vsel %vm93_vm1, %v98_v17, %v39_v4 }
  0x12   :  { %v43_v19 = vadd.f32 %v91_v18, %v42_v16  ;;  %v44_v21 = vadd.f32 %v99_v20, %v42_v16 }
  0x14   :  { %v80_v22 = vmax.f32 %v43_v19, -128.0  ;;  %v82_v23 = vmax.f32 %v44_v21, -128.0 }
  0x16   :  { %v81_v24 = vmin.f32 %v80_v22, 127.0  ;;  %v83_v25 = vmin.f32 %v82_v23, 127.0 }
  0x18   :  { %vm100_vm2 = vcmp.lt.s32.totalorder %v81_v24, 0  ;;  %v101_v26 = vceil.f32 %v81_v24  ;;  %v102_v27 = vfloor.f32 %v81_v24  ;;  %vm105_vm3 = vcmp.lt.s32.totalorder %v83_v25, 0 }
  0x19   :  { %v106_v28 = vceil.f32 %v83_v25  ;;  %v107_v29 = vfloor.f32 %v83_v25 }
  0x1a   :  { %v103_v30 = vsel %vm100_vm2, %v101_v26, %v102_v27 }
  0x1b   :  { %v104_v31 = vcvt.f32.s32 %v103_v30  ;;  %v108_v32 = vsel %vm105_vm3, %v106_v28, %v107_v29 }
  0x1c   :  { %v109_v33 = vcvt.f32.s32 %v108_v32 }
  0x1d   :  { %v55_v34 = vpack.c.b16 %v104_v31, %v104_v31 }
  0x1e   :  { %v57_v35 = vpack.c.b16 %v109_v33, %v109_v33 }
  0x1f   :  { %v56_v36 = vpack.c.b8 %v55_v34, %v55_v34 }
  0x20   :  { %v58_v37 = vpack.c.b8 %v57_v35, %v57_v35 }
  0x21   :  { %59 = vst [vmem:[#allocation7] sm:$0x3] %v56_v36 }
  0x22   :  { %60 = vst [vmem:[#allocation7 + $0x2] sm:$0x3] %v58_v37 }
  0x23   :  { %73 = dma.vmem_to_hbm [thread:$0]  %s66_s1, 64, %s68_s24, [#allocation6], %s172_s25, %s172_s25, %s173_s26  }
  0x24   :  { %166 = dma.done.wait [#allocation6], 64  }
  0x25   :  { %167 = vsyncadd [#allocation6], 4294967232 }
  0x26   :  { %78 = vsyncpa [#allocation5], 1 }
  0x27   :  { %79 = vsyncpa [#allocation6], 1 }

</bundles_post_ra>
